<compile_context>
chip_gen: v7x
topology: tpu7x:2x2x1
jax: 0.10.0
libtpu: 0.0.40
codegen_flags: <defaults>
</compile_context>

<pallas_src>
import jax
import jax.numpy as jnp
from jax import lax
from jax.experimental import pallas as pl
from jax.experimental.pallas import tpu as pltpu

N_CLASS = 16     # toy vocabulary size (module: len(word_dict))
N_HIDDEN = 50    # matches the PyTorch module's n_hidden
BT = 8           # batch tile = f32 sublane count


def _round_up(v, m):
    return ((v + m - 1) // m) * m


def _pad_gate_dim(arr, H, H_pad, axis=0):
    """Zero-pad each of the 4 stacked LSTM gate blocks (i, f, g, o) from H to H_pad."""
    blocks = jnp.split(arr, 4, axis=axis)
    pad_width = [(0, 0)] * arr.ndim
    pad_width[axis] = (0, H_pad - H)
    return jnp.concatenate([jnp.pad(b, pad_width) for b in blocks], axis=axis)


def text_lstm_kernel(x_ref, w_ih_ref, w_hh_ref, b_g_ref, w_out_ref, b_out_ref, out_ref):
    """One batch tile of the TextLSTM forward pass.

    x_ref     : (1, seq*BT, C_pad)  time-major rows within this batch tile (row = t*BT + b)
    w_ih_ref  : (C_pad, 4*H_pad)    input->gates weights (padded weight_ih_l0.T)
    w_hh_ref  : (H_pad, 4*H_pad)    hidden->gates weights (padded weight_hh_l0.T)
    b_g_ref   : (1, 4*H_pad)        bias_ih + bias_hh (padded)
    w_out_ref : (H_pad, C_pad)      self.W.weight.T (padded)
    b_out_ref : (1, C_pad)          self.b (padded)
    out_ref   : (BT, C_pad)         logits for this batch tile (lane-dense, 128 wide)
    """
    bt = out_ref.shape[0]
    h_pad = w_hh_ref.shape[0]
    seq_len = x_ref.shape[1] // bt

    w_hh = w_hh_ref[...]
    x2d = x_ref[0]                                                # (seq*BT, C_pad)

    # Hoisted input projection for ALL timesteps: one matmul, bias folded in once.
    gates_x = (jnp.dot(x2d, w_ih_ref[...], preferred_element_type=jnp.float32)
               + b_g_ref[...])                                    # (seq*BT, 4*H_pad)

    h = jnp.zeros((bt, h_pad), jnp.float32)
    c = jnp.zeros((bt, h_pad), jnp.float32)

    # Fully-unrolled recurrence (small static seq); only the (BT, H_pad) x (H_pad, 4H_pad)
    # recurrent matmul sits on the serial critical path.
    for t in range(seq_len):
        # BT == 8 rows -> every per-step slice starts on an (8,128) tile boundary (free view).
        g_x = gates_x[t * bt:(t + 1) * bt, :]
        gates = g_x + jnp.dot(h, w_hh, preferred_element_type=jnp.float32)
        # One full-width sigmoid + one full-width tanh over all 4*H_pad lanes, then slices.
        sig = jax.nn.sigmoid(gates)
        tnh = jnp.tanh(gates)
        i = sig[:, 0 * h_pad:1 * h_pad]      # input gate
        f = sig[:, 1 * h_pad:2 * h_pad]      # forget gate
        g = tnh[:, 2 * h_pad:3 * h_pad]      # cell candidate
        o = sig[:, 3 * h_pad:4 * h_pad]      # output gate
        c = f * c + i * g
        h = o * jnp.tanh(c)

    # Lane-dense (128-wide) output block -> unmasked vector stores.
    out_ref[...] = (jnp.dot(h, w_out_ref[...], preferred_element_type=jnp.float32)
                    + b_out_ref[...])


def text_lstm_forward(x, params):
    """x: (batch, seq, n_class) float32. Returns logits (batch, n_class)."""
    batch, seq, n_class = x.shape
    w_ih, w_hh, b_ih, b_hh, w_lin, b = params
    H = w_hh.shape[1]

    H_pad = _round_up(H, 64)            # 50 -> 64, so 4*H_pad = 256 (one v6e/v7x MXU pass)
    C_pad = _round_up(n_class, 128)     # lane-dense input/output
    batch_pad = _round_up(batch, BT)    # sublane-aligned per-step slices
    n_bt = batch_pad // BT

    # --- weight / bias padding (zeros keep padded hidden units identically 0) ---
    w_ih_p = _pad_gate_dim(w_ih, H, H_pad, axis=0)                    # (4H_pad, n_class)
    w_ih_p = jnp.pad(w_ih_p, ((0, 0), (0, C_pad - n_class))).T        # (C_pad, 4H_pad)
    w_hh_p = _pad_gate_dim(w_hh, H, H_pad, axis=0)                    # (4H_pad, H)
    w_hh_p = jnp.pad(w_hh_p, ((0, 0), (0, H_pad - H))).T              # (H_pad, 4H_pad)
    b_g = _pad_gate_dim(b_ih + b_hh, H, H_pad, axis=0)[None, :]       # (1, 4H_pad)
    w_out_p = jnp.pad(w_lin, ((0, C_pad - n_class), (0, H_pad - H))).T  # (H_pad, C_pad)
    b_out_p = jnp.pad(b, (0, C_pad - n_class))[None, :]               # (1, C_pad)

    # --- input layout: X.transpose(0,1), pad batch & vocab, group rows per batch tile ---
    x_p = jnp.pad(x, ((0, batch_pad - batch), (0, 0), (0, C_pad - n_class)))
    x_tm = jnp.transpose(x_p, (1, 0, 2))                              # (seq, batch_pad, C_pad)
    x_tiles = (x_tm.reshape(seq, n_bt, BT, C_pad)
               .transpose(1, 0, 2, 3)
               .reshape(n_bt, seq * BT, C_pad))                       # row = t*BT + local b

    def full(shape):
        return pl.BlockSpec(shape, lambda i: (0,) * len(shape))

    out = pl.pallas_call(
        text_lstm_kernel,
        out_shape=jax.ShapeDtypeStruct((batch_pad, C_pad), jnp.float32),
        grid=(n_bt,),
        in_specs=[
            pl.BlockSpec((1, seq * BT, C_pad), lambda i: (i, 0, 0)),  # per-tile inputs
            full((C_pad, 4 * H_pad)),
            full((H_pad, 4 * H_pad)),
            full((1, 4 * H_pad)),
            full((H_pad, C_pad)),
            full((1, C_pad)),
        ],
        out_specs=pl.BlockSpec((BT, C_pad), lambda i: (i, 0)),
        compiler_params=pltpu.CompilerParams(
            dimension_semantics=("parallel",)),   # batch tiles shard across v7x's 2 TCs
    )(x_tiles, w_ih_p, w_hh_p, b_g, w_out_p, b_out_p)

    return out[:batch, :n_class]


def init_params(key, n_class=N_CLASS, n_hidden=N_HIDDEN):
    """Deterministic init mirroring nn.LSTM / nn.Linear shapes (uniform +/- 1/sqrt(H))."""
    ks = jax.random.split(key, 5)
    bound = 1.0 / jnp.sqrt(jnp.float32(n_hidden))
    w_ih = jax.random.uniform(ks[0], (4 * n_hidden, n_class), jnp.float32, -bound, bound)
    w_hh = jax.random.uniform(ks[1], (4 * n_hidden, n_hidden), jnp.float32, -bound, bound)
    b_ih = jax.random.uniform(ks[2], (4 * n_hidden,), jnp.float32, -bound, bound)
    b_hh = jax.random.uniform(ks[3], (4 * n_hidden,), jnp.float32, -bound, bound)
    w_lin = jax.random.uniform(ks[4], (n_class, n_hidden), jnp.float32, -bound, bound)
    b = jnp.ones((n_class,), jnp.float32)        # self.b = nn.Parameter(torch.ones([n_class]))
    return (w_ih, w_hh, b_ih, b_hh, w_lin, b)


def text_lstm_reference(x, params):
    """Pure-JAX reference (unpadded) mirroring PyTorch LSTM semantics."""
    w_ih, w_hh, b_ih, b_hh, w_lin, b = params
    batch = x.shape[0]
    H = w_hh.shape[1]
    x_tm = jnp.transpose(x, (1, 0, 2))
    h = jnp.zeros((batch, H), jnp.float32)
    c = jnp.zeros((batch, H), jnp.float32)
    hp = lax.Precision.HIGHEST

    def step(carry, x_t):
        h, c = carry
        gates = (jnp.dot(x_t, w_ih.T, precision=hp)
                 + jnp.dot(h, w_hh.T, precision=hp) + b_ih + b_hh)
        i = jax.nn.sigmoid(gates[:, 0 * H:1 * H])
        f = jax.nn.sigmoid(gates[:, 1 * H:2 * H])
        g = jnp.tanh(gates[:, 2 * H:3 * H])
        o = jax.nn.sigmoid(gates[:, 3 * H:4 * H])
        c = f * c + i * g
        h = o * jnp.tanh(c)
        return (h, c), None

    (h, c), _ = lax.scan(step, (h, c), x_tm)
    return jnp.dot(h, w_lin.T, precision=hp) + b


if __name__ == "__main__":
    key = jax.random.PRNGKey(0)
    k_par, k_tok = jax.random.split(key)

    batch, seq = 2, 8
    params = init_params(k_par)

    # One-hot token inputs, as the language model would feed the LSTM.
    tokens = jax.random.randint(k_tok, (batch, seq), 0, N_CLASS)
    x = jax.nn.one_hot(tokens, N_CLASS, dtype=jnp.float32)   # (batch, seq, n_class)

    out = text_lstm_forward(x, params)
    out = jax.block_until_ready(out)

    ref = text_lstm_reference(x, params)
    assert out.shape == (batch, N_CLASS)
    assert jnp.allclose(out, ref, atol=2e-5, rtol=2e-5), "Pallas kernel mismatch vs reference"

    print("KERNEL_OK")
</pallas_src>

<mosaic_0001>
module attributes {stable_mosaic.version = 11 : i64} {
  func.func @text_lstm_kernel(%arg0: i32, %arg1: memref<1x64x128xf32, #tpu.memory_space<vmem>>, %arg2: memref<128x256xf32, #tpu.memory_space<vmem>>, %arg3: memref<64x256xf32, #tpu.memory_space<vmem>>, %arg4: memref<1x256xf32, #tpu.memory_space<vmem>>, %arg5: memref<64x128xf32, #tpu.memory_space<vmem>>, %arg6: memref<1x128xf32, #tpu.memory_space<vmem>>, %arg7: memref<8x128xf32, #tpu.memory_space<vmem>>) attributes {dimension_semantics = [#tpu.dimension_semantics<parallel>], iteration_bounds = array<i64: 1>, scalar_prefetch = 0 : i64, scratch_operands = 0 : i64, tpu.core_type = #tpu.core_type<tc>, window_params = [{transform_indices = @transform_0, window_bounds = array<i64: 1, 64, 128>}, {pipeline_mode = #tpu.pipeline_mode<synchronous>, transform_indices = @transform_1, window_bounds = array<i64: 128, 256>}, {pipeline_mode = #tpu.pipeline_mode<synchronous>, transform_indices = @transform_2, window_bounds = array<i64: 64, 256>}, {pipeline_mode = #tpu.pipeline_mode<synchronous>, transform_indices = @transform_3, window_bounds = array<i64: 1, 256>}, {pipeline_mode = #tpu.pipeline_mode<synchronous>, transform_indices = @transform_4, window_bounds = array<i64: 64, 128>}, {pipeline_mode = #tpu.pipeline_mode<synchronous>, transform_indices = @transform_5, window_bounds = array<i64: 1, 128>}, {transform_indices = @transform_6, window_bounds = array<i64: 8, 128>}]} {
    %c0 = arith.constant 0 : index
    %c0_0 = arith.constant 0 : index
    %0 = vector.load %arg3[%c0, %c0_0] : memref<64x256xf32, #tpu.memory_space<vmem>>, vector<64x256xf32>
    %c0_1 = arith.constant 0 : index
    %c0_2 = arith.constant 0 : index
    %c0_3 = arith.constant 0 : index
    %1 = vector.load %arg1[%c0_1, %c0_2, %c0_3] : memref<1x64x128xf32, #tpu.memory_space<vmem>>, vector<1x64x128xf32>
    %2 = vector.shape_cast %1 : vector<1x64x128xf32> to vector<64x128xf32>
    %c0_4 = arith.constant 0 : index
    %c0_5 = arith.constant 0 : index
    %3 = vector.load %arg2[%c0_4, %c0_5] : memref<128x256xf32, #tpu.memory_space<vmem>>, vector<128x256xf32>
    %cst = arith.constant dense<0.000000e+00> : vector<64x256xf32>
    %4 = tpu.matmul %2, %3, %cst {dimension_numbers = #tpu.dot_dimension_numbers<[1], [0], [0], [1], [0, 0, 1, 1], [], []>} : vector<64x128xf32>, vector<128x256xf32>, vector<64x256xf32> -> vector<64x256xf32>
    %c0_6 = arith.constant 0 : index
    %c0_7 = arith.constant 0 : index
    %5 = vector.load %arg4[%c0_6, %c0_7] : memref<1x256xf32, #tpu.memory_space<vmem>>, vector<1x256xf32>
    %6 = vector.broadcast %5 : vector<1x256xf32> to vector<64x256xf32>
    %7 = arith.addf %4, %6 : vector<64x256xf32>
    %cst_8 = arith.constant 0.000000e+00 : f32
    %8 = vector.broadcast %cst_8 : f32 to vector<8x64xf32>
    %cst_9 = arith.constant 0.000000e+00 : f32
    %9 = vector.broadcast %cst_9 : f32 to vector<8x64xf32>
    %10 = vector.extract_strided_slice %7 {offsets = [0, 0], sizes = [8, 256], strides = [1, 1]} : vector<64x256xf32> to vector<8x256xf32>
    %cst_10 = arith.constant dense<0.000000e+00> : vector<8x256xf32>
    %11 = tpu.matmul %8, %0, %cst_10 {dimension_numbers = #tpu.dot_dimension_numbers<[1], [0], [0], [1], [0, 0, 1, 1], [], []>} : vector<8x64xf32>, vector<64x256xf32>, vector<8x256xf32> -> vector<8x256xf32>
    %12 = arith.addf %10, %11 : vector<8x256xf32>
    %13 = arith.negf %12 : vector<8x256xf32>
    %14 = math.exp %13 : vector<8x256xf32>
    %cst_11 = arith.constant 1.000000e+00 : f32
    %15 = vector.broadcast %cst_11 : f32 to vector<8x256xf32>
    %16 = arith.addf %15, %14 : vector<8x256xf32>
    %17 = arith.divf %15, %16 : vector<8x256xf32>
    %18 = math.tanh %12 : vector<8x256xf32>
    %19 = vector.extract_strided_slice %17 {offsets = [0, 0], sizes = [8, 64], strides = [1, 1]} : vector<8x256xf32> to vector<8x64xf32>
    %20 = vector.extract_strided_slice %17 {offsets = [0, 64], sizes = [8, 64], strides = [1, 1]} : vector<8x256xf32> to vector<8x64xf32>
    %21 = vector.extract_strided_slice %18 {offsets = [0, 128], sizes = [8, 64], strides = [1, 1]} : vector<8x256xf32> to vector<8x64xf32>
    %22 = vector.extract_strided_slice %17 {offsets = [0, 192], sizes = [8, 64], strides = [1, 1]} : vector<8x256xf32> to vector<8x64xf32>
    %23 = arith.mulf %20, %9 : vector<8x64xf32>
    %24 = arith.mulf %19, %21 : vector<8x64xf32>
    %25 = arith.addf %23, %24 : vector<8x64xf32>
    %26 = math.tanh %25 : vector<8x64xf32>
    %27 = arith.mulf %22, %26 : vector<8x64xf32>
    %28 = vector.extract_strided_slice %7 {offsets = [8, 0], sizes = [8, 256], strides = [1, 1]} : vector<64x256xf32> to vector<8x256xf32>
    %cst_12 = arith.constant dense<0.000000e+00> : vector<8x256xf32>
    %29 = tpu.matmul %27, %0, %cst_12 {dimension_numbers = #tpu.dot_dimension_numbers<[1], [0], [0], [1], [0, 0, 1, 1], [], []>} : vector<8x64xf32>, vector<64x256xf32>, vector<8x256xf32> -> vector<8x256xf32>
    %30 = arith.addf %28, %29 : vector<8x256xf32>
    %31 = arith.negf %30 : vector<8x256xf32>
    %32 = math.exp %31 : vector<8x256xf32>
    %cst_13 = arith.constant 1.000000e+00 : f32
    %33 = vector.broadcast %cst_13 : f32 to vector<8x256xf32>
    %34 = arith.addf %33, %32 : vector<8x256xf32>
    %35 = arith.divf %33, %34 : vector<8x256xf32>
    %36 = math.tanh %30 : vector<8x256xf32>
    %37 = vector.extract_strided_slice %35 {offsets = [0, 0], sizes = [8, 64], strides = [1, 1]} : vector<8x256xf32> to vector<8x64xf32>
    %38 = vector.extract_strided_slice %35 {offsets = [0, 64], sizes = [8, 64], strides = [1, 1]} : vector<8x256xf32> to vector<8x64xf32>
    %39 = vector.extract_strided_slice %36 {offsets = [0, 128], sizes = [8, 64], strides = [1, 1]} : vector<8x256xf32> to vector<8x64xf32>
    %40 = vector.extract_strided_slice %35 {offsets = [0, 192], sizes = [8, 64], strides = [1, 1]} : vector<8x256xf32> to vector<8x64xf32>
    %41 = arith.mulf %38, %25 : vector<8x64xf32>
    %42 = arith.mulf %37, %39 : vector<8x64xf32>
    %43 = arith.addf %41, %42 : vector<8x64xf32>
    %44 = math.tanh %43 : vector<8x64xf32>
    %45 = arith.mulf %40, %44 : vector<8x64xf32>
    %46 = vector.extract_strided_slice %7 {offsets = [16, 0], sizes = [8, 256], strides = [1, 1]} : vector<64x256xf32> to vector<8x256xf32>
    %cst_14 = arith.constant dense<0.000000e+00> : vector<8x256xf32>
    %47 = tpu.matmul %45, %0, %cst_14 {dimension_numbers = #tpu.dot_dimension_numbers<[1], [0], [0], [1], [0, 0, 1, 1], [], []>} : vector<8x64xf32>, vector<64x256xf32>, vector<8x256xf32> -> vector<8x256xf32>
    %48 = arith.addf %46, %47 : vector<8x256xf32>
    %49 = arith.negf %48 : vector<8x256xf32>
    %50 = math.exp %49 : vector<8x256xf32>
    %cst_15 = arith.constant 1.000000e+00 : f32
    %51 = vector.broadcast %cst_15 : f32 to vector<8x256xf32>
    %52 = arith.addf %51, %50 : vector<8x256xf32>
    %53 = arith.divf %51, %52 : vector<8x256xf32>
    %54 = math.tanh %48 : vector<8x256xf32>
    %55 = vector.extract_strided_slice %53 {offsets = [0, 0], sizes = [8, 64], strides = [1, 1]} : vector<8x256xf32> to vector<8x64xf32>
    %56 = vector.extract_strided_slice %53 {offsets = [0, 64], sizes = [8, 64], strides = [1, 1]} : vector<8x256xf32> to vector<8x64xf32>
    %57 = vector.extract_strided_slice %54 {offsets = [0, 128], sizes = [8, 64], strides = [1, 1]} : vector<8x256xf32> to vector<8x64xf32>
    %58 = vector.extract_strided_slice %53 {offsets = [0, 192], sizes = [8, 64], strides = [1, 1]} : vector<8x256xf32> to vector<8x64xf32>
    %59 = arith.mulf %56, %43 : vector<8x64xf32>
    %60 = arith.mulf %55, %57 : vector<8x64xf32>
    %61 = arith.addf %59, %60 : vector<8x64xf32>
    %62 = math.tanh %61 : vector<8x64xf32>
    %63 = arith.mulf %58, %62 : vector<8x64xf32>
    %64 = vector.extract_strided_slice %7 {offsets = [24, 0], sizes = [8, 256], strides = [1, 1]} : vector<64x256xf32> to vector<8x256xf32>
    %cst_16 = arith.constant dense<0.000000e+00> : vector<8x256xf32>
    %65 = tpu.matmul %63, %0, %cst_16 {dimension_numbers = #tpu.dot_dimension_numbers<[1], [0], [0], [1], [0, 0, 1, 1], [], []>} : vector<8x64xf32>, vector<64x256xf32>, vector<8x256xf32> -> vector<8x256xf32>
    %66 = arith.addf %64, %65 : vector<8x256xf32>
    %67 = arith.negf %66 : vector<8x256xf32>
    %68 = math.exp %67 : vector<8x256xf32>
    %cst_17 = arith.constant 1.000000e+00 : f32
    %69 = vector.broadcast %cst_17 : f32 to vector<8x256xf32>
    %70 = arith.addf %69, %68 : vector<8x256xf32>
    %71 = arith.divf %69, %70 : vector<8x256xf32>
    %72 = math.tanh %66 : vector<8x256xf32>
    %73 = vector.extract_strided_slice %71 {offsets = [0, 0], sizes = [8, 64], strides = [1, 1]} : vector<8x256xf32> to vector<8x64xf32>
    %74 = vector.extract_strided_slice %71 {offsets = [0, 64], sizes = [8, 64], strides = [1, 1]} : vector<8x256xf32> to vector<8x64xf32>
    %75 = vector.extract_strided_slice %72 {offsets = [0, 128], sizes = [8, 64], strides = [1, 1]} : vector<8x256xf32> to vector<8x64xf32>
    %76 = vector.extract_strided_slice %71 {offsets = [0, 192], sizes = [8, 64], strides = [1, 1]} : vector<8x256xf32> to vector<8x64xf32>
    %77 = arith.mulf %74, %61 : vector<8x64xf32>
    %78 = arith.mulf %73, %75 : vector<8x64xf32>
    %79 = arith.addf %77, %78 : vector<8x64xf32>
    %80 = math.tanh %79 : vector<8x64xf32>
    %81 = arith.mulf %76, %80 : vector<8x64xf32>
    %82 = vector.extract_strided_slice %7 {offsets = [32, 0], sizes = [8, 256], strides = [1, 1]} : vector<64x256xf32> to vector<8x256xf32>
    %cst_18 = arith.constant dense<0.000000e+00> : vector<8x256xf32>
    %83 = tpu.matmul %81, %0, %cst_18 {dimension_numbers = #tpu.dot_dimension_numbers<[1], [0], [0], [1], [0, 0, 1, 1], [], []>} : vector<8x64xf32>, vector<64x256xf32>, vector<8x256xf32> -> vector<8x256xf32>
    %84 = arith.addf %82, %83 : vector<8x256xf32>
    %85 = arith.negf %84 : vector<8x256xf32>
    %86 = math.exp %85 : vector<8x256xf32>
    %cst_19 = arith.constant 1.000000e+00 : f32
    %87 = vector.broadcast %cst_19 : f32 to vector<8x256xf32>
    %88 = arith.addf %87, %86 : vector<8x256xf32>
    %89 = arith.divf %87, %88 : vector<8x256xf32>
    %90 = math.tanh %84 : vector<8x256xf32>
    %91 = vector.extract_strided_slice %89 {offsets = [0, 0], sizes = [8, 64], strides = [1, 1]} : vector<8x256xf32> to vector<8x64xf32>
    %92 = vector.extract_strided_slice %89 {offsets = [0, 64], sizes = [8, 64], strides = [1, 1]} : vector<8x256xf32> to vector<8x64xf32>
    %93 = vector.extract_strided_slice %90 {offsets = [0, 128], sizes = [8, 64], strides = [1, 1]} : vector<8x256xf32> to vector<8x64xf32>
    %94 = vector.extract_strided_slice %89 {offsets = [0, 192], sizes = [8, 64], strides = [1, 1]} : vector<8x256xf32> to vector<8x64xf32>
    %95 = arith.mulf %92, %79 : vector<8x64xf32>
    %96 = arith.mulf %91, %93 : vector<8x64xf32>
    %97 = arith.addf %95, %96 : vector<8x64xf32>
    %98 = math.tanh %97 : vector<8x64xf32>
    %99 = arith.mulf %94, %98 : vector<8x64xf32>
    %100 = vector.extract_strided_slice %7 {offsets = [40, 0], sizes = [8, 256], strides = [1, 1]} : vector<64x256xf32> to vector<8x256xf32>
    %cst_20 = arith.constant dense<0.000000e+00> : vector<8x256xf32>
    %101 = tpu.matmul %99, %0, %cst_20 {dimension_numbers = #tpu.dot_dimension_numbers<[1], [0], [0], [1], [0, 0, 1, 1], [], []>} : vector<8x64xf32>, vector<64x256xf32>, vector<8x256xf32> -> vector<8x256xf32>
    %102 = arith.addf %100, %101 : vector<8x256xf32>
    %103 = arith.negf %102 : vector<8x256xf32>
    %104 = math.exp %103 : vector<8x256xf32>
    %cst_21 = arith.constant 1.000000e+00 : f32
    %105 = vector.broadcast %cst_21 : f32 to vector<8x256xf32>
    %106 = arith.addf %105, %104 : vector<8x256xf32>
    %107 = arith.divf %105, %106 : vector<8x256xf32>
    %108 = math.tanh %102 : vector<8x256xf32>
    %109 = vector.extract_strided_slice %107 {offsets = [0, 0], sizes = [8, 64], strides = [1, 1]} : vector<8x256xf32> to vector<8x64xf32>
    %110 = vector.extract_strided_slice %107 {offsets = [0, 64], sizes = [8, 64], strides = [1, 1]} : vector<8x256xf32> to vector<8x64xf32>
    %111 = vector.extract_strided_slice %108 {offsets = [0, 128], sizes = [8, 64], strides = [1, 1]} : vector<8x256xf32> to vector<8x64xf32>
    %112 = vector.extract_strided_slice %107 {offsets = [0, 192], sizes = [8, 64], strides = [1, 1]} : vector<8x256xf32> to vector<8x64xf32>
    %113 = arith.mulf %110, %97 : vector<8x64xf32>
    %114 = arith.mulf %109, %111 : vector<8x64xf32>
    %115 = arith.addf %113, %114 : vector<8x64xf32>
    %116 = math.tanh %115 : vector<8x64xf32>
    %117 = arith.mulf %112, %116 : vector<8x64xf32>
    %118 = vector.extract_strided_slice %7 {offsets = [48, 0], sizes = [8, 256], strides = [1, 1]} : vector<64x256xf32> to vector<8x256xf32>
    %cst_22 = arith.constant dense<0.000000e+00> : vector<8x256xf32>
    %119 = tpu.matmul %117, %0, %cst_22 {dimension_numbers = #tpu.dot_dimension_numbers<[1], [0], [0], [1], [0, 0, 1, 1], [], []>} : vector<8x64xf32>, vector<64x256xf32>, vector<8x256xf32> -> vector<8x256xf32>
    %120 = arith.addf %118, %119 : vector<8x256xf32>
    %121 = arith.negf %120 : vector<8x256xf32>
    %122 = math.exp %121 : vector<8x256xf32>
    %cst_23 = arith.constant 1.000000e+00 : f32
    %123 = vector.broadcast %cst_23 : f32 to vector<8x256xf32>
    %124 = arith.addf %123, %122 : vector<8x256xf32>
    %125 = arith.divf %123, %124 : vector<8x256xf32>
    %126 = math.tanh %120 : vector<8x256xf32>
    %127 = vector.extract_strided_slice %125 {offsets = [0, 0], sizes = [8, 64], strides = [1, 1]} : vector<8x256xf32> to vector<8x64xf32>
    %128 = vector.extract_strided_slice %125 {offsets = [0, 64], sizes = [8, 64], strides = [1, 1]} : vector<8x256xf32> to vector<8x64xf32>
    %129 = vector.extract_strided_slice %126 {offsets = [0, 128], sizes = [8, 64], strides = [1, 1]} : vector<8x256xf32> to vector<8x64xf32>
    %130 = vector.extract_strided_slice %125 {offsets = [0, 192], sizes = [8, 64], strides = [1, 1]} : vector<8x256xf32> to vector<8x64xf32>
    %131 = arith.mulf %128, %115 : vector<8x64xf32>
    %132 = arith.mulf %127, %129 : vector<8x64xf32>
    %133 = arith.addf %131, %132 : vector<8x64xf32>
    %134 = math.tanh %133 : vector<8x64xf32>
    %135 = arith.mulf %130, %134 : vector<8x64xf32>
    %136 = vector.extract_strided_slice %7 {offsets = [56, 0], sizes = [8, 256], strides = [1, 1]} : vector<64x256xf32> to vector<8x256xf32>
    %cst_24 = arith.constant dense<0.000000e+00> : vector<8x256xf32>
    %137 = tpu.matmul %135, %0, %cst_24 {dimension_numbers = #tpu.dot_dimension_numbers<[1], [0], [0], [1], [0, 0, 1, 1], [], []>} : vector<8x64xf32>, vector<64x256xf32>, vector<8x256xf32> -> vector<8x256xf32>
    %138 = arith.addf %136, %137 : vector<8x256xf32>
    %139 = arith.negf %138 : vector<8x256xf32>
    %140 = math.exp %139 : vector<8x256xf32>
    %cst_25 = arith.constant 1.000000e+00 : f32
    %141 = vector.broadcast %cst_25 : f32 to vector<8x256xf32>
    %142 = arith.addf %141, %140 : vector<8x256xf32>
    %143 = arith.divf %141, %142 : vector<8x256xf32>
    %144 = math.tanh %138 : vector<8x256xf32>
    %145 = vector.extract_strided_slice %143 {offsets = [0, 0], sizes = [8, 64], strides = [1, 1]} : vector<8x256xf32> to vector<8x64xf32>
    %146 = vector.extract_strided_slice %143 {offsets = [0, 64], sizes = [8, 64], strides = [1, 1]} : vector<8x256xf32> to vector<8x64xf32>
    %147 = vector.extract_strided_slice %144 {offsets = [0, 128], sizes = [8, 64], strides = [1, 1]} : vector<8x256xf32> to vector<8x64xf32>
    %148 = vector.extract_strided_slice %143 {offsets = [0, 192], sizes = [8, 64], strides = [1, 1]} : vector<8x256xf32> to vector<8x64xf32>
    %149 = arith.mulf %146, %133 : vector<8x64xf32>
    %150 = arith.mulf %145, %147 : vector<8x64xf32>
    %151 = arith.addf %149, %150 : vector<8x64xf32>
    %152 = math.tanh %151 : vector<8x64xf32>
    %153 = arith.mulf %148, %152 : vector<8x64xf32>
    %c0_26 = arith.constant 0 : index
    %c0_27 = arith.constant 0 : index
    %154 = vector.load %arg5[%c0_26, %c0_27] : memref<64x128xf32, #tpu.memory_space<vmem>>, vector<64x128xf32>
    %cst_28 = arith.constant dense<0.000000e+00> : vector<8x128xf32>
    %155 = tpu.matmul %153, %154, %cst_28 {dimension_numbers = #tpu.dot_dimension_numbers<[1], [0], [0], [1], [0, 0, 1, 1], [], []>} : vector<8x64xf32>, vector<64x128xf32>, vector<8x128xf32> -> vector<8x128xf32>
    %c0_29 = arith.constant 0 : index
    %c0_30 = arith.constant 0 : index
    %156 = vector.load %arg6[%c0_29, %c0_30] : memref<1x128xf32, #tpu.memory_space<vmem>>, vector<1x128xf32>
    %157 = vector.broadcast %156 : vector<1x128xf32> to vector<8x128xf32>
    %158 = arith.addf %155, %157 : vector<8x128xf32>
    %c0_31 = arith.constant 0 : index
    %c0_32 = arith.constant 0 : index
    %159 = vector.load %arg7[%c0_31, %c0_32] : memref<8x128xf32, #tpu.memory_space<vmem>>, vector<8x128xf32>
    tpu.vector_store %arg7[%c0_31, %c0_32], %158 {strides = array<i32>} : memref<8x128xf32, #tpu.memory_space<vmem>>, vector<8x128xf32>,
    return
  }
  func.func @transform_0(%arg0: i32) -> (i32, i32, i32) {
    %c0_i32 = arith.constant 0 : i32
    %c0_i32_0 = arith.constant 0 : i32
    %c0_i32_1 = arith.constant 0 : i32
    return %arg0, %c0_i32, %c0_i32_0 : i32, i32, i32
  }
  func.func @transform_1(%arg0: i32) -> (i32, i32) {
    %c0_i32 = arith.constant 0 : i32
    %c0_i32_0 = arith.constant 0 : i32
    %c0_i32_1 = arith.constant 0 : i32
    return %c0_i32, %c0_i32_0 : i32, i32
  }
  func.func @transform_2(%arg0: i32) -> (i32, i32) {
    %c0_i32 = arith.constant 0 : i32
    %c0_i32_0 = arith.constant 0 : i32
    %c0_i32_1 = arith.constant 0 : i32
    return %c0_i32, %c0_i32_0 : i32, i32
  }
  func.func @transform_3(%arg0: i32) -> (i32, i32) {
    %c0_i32 = arith.constant 0 : i32
    %c0_i32_0 = arith.constant 0 : i32
    %c0_i32_1 = arith.constant 0 : i32
    return %c0_i32, %c0_i32_0 : i32, i32
  }
  func.func @transform_4(%arg0: i32) -> (i32, i32) {
    %c0_i32 = arith.constant 0 : i32
    %c0_i32_0 = arith.constant 0 : i32
    %c0_i32_1 = arith.constant 0 : i32
    return %c0_i32, %c0_i32_0 : i32, i32
  }
  func.func @transform_5(%arg0: i32) -> (i32, i32) {
    %c0_i32 = arith.constant 0 : i32
    %c0_i32_0 = arith.constant 0 : i32
    %c0_i32_1 = arith.constant 0 : i32
    return %c0_i32, %c0_i32_0 : i32, i32
  }
  func.func @transform_6(%arg0: i32) -> (i32, i32) {
    %c0_i32 = arith.constant 0 : i32
    %c0_i32_0 = arith.constant 0 : i32
    return %arg0, %c0_i32 : i32, i32
  }
}

</mosaic_0001>

<bundles_post_ra>
// kernel: tpu_custom_call.1
= control target key start
LH: loop header
LB: loop body
LE: loop exit
PB: predicated region body
PF: predicated region fallthrough
CT: control target
= control target key end

     0   :  { %11 = vsyncpa [#allocation3], 0  ;;  %s1962_s0 = inlined_call_operand.hbm [shape: f32[1,64,128], index: 0, kind: input, shape index: {}]   ;;  %s1963_s1 = inlined_call_operand.hbm [shape: f32[128,256], index: 1, kind: input, shape index: {}]   ;;  %s1964_s2 = inlined_call_operand.hbm [shape: f32[64,256], index: 2, kind: input, shape index: {}]   ;;  %s1965_s3 = inlined_call_operand.vmem [shape: f32[1,256], index: 3, kind: input, shape index: {}]   ;;  %s1966_s4 = inlined_call_operand.hbm [shape: f32[64,128], index: 4, kind: input, shape index: {}]   ;;  %s1967_s5 = inlined_call_operand.vmem [shape: f32[1,128], index: 5, kind: input, shape index: {}]   ;;  %s1968_s6 = inlined_call_operand.hbm [shape: f32[8,128], index: 6, kind: output, shape index: {}]  }
   0x1   :  { %12 = vsyncpa [#allocation6], 0 }
   0x2   :  { %13 = vsyncpa [#allocation9], 0 }
   0x3   :  { %14 = vsyncpa [#allocation4], 0  ;;  %s1651_s21 = smov [#allocation5]   ;;  %s1533_s25 = scalar_lea.hbm %s1963_s1, 4096 }
   0x4   :  { %s32_s22 = sshll.u32 %s1651_s21, 4  ;;  %p1534_p0 = scmp.ne.s32.totalorder %s1963_s1, %s1533_s25  ;;  %s33_s22 = int_to_ptr.vmem [resolvable:$true] %s32_s22 }
   0x5   :  { %p1537_p1 = scmp.lt.u32.totalorder %s1533_s25, %s1963_s1 }
   0x7   :  { %p1539_p2 = pnand %p1537_p1, %p1534_p0 }
   0x9   :  { %1542 = shalt.err (!%p1539_p2)
}
   0xa   :  { %s1543_s30 = scalar_lea.vmem %s33_s22, 4096  ;;  %p1548_p4 = scmp.lt.s32.totalorder %s33_s22, %s33_s22 }
   0xb   :  { %p1544_p3 = scmp.ne.s32.totalorder %s33_s22, %s1543_s30  ;;  %p1549_p5 = scmp.lt.s32.totalorder %s1543_s30, %s1543_s30 }
   0xd   :  { %p1550_p6 = por %p1549_p5, %p1548_p4 }
   0xf   :  { %p1551_p7 = pnand %p1550_p6, %p1544_p3 }
  0x11   :  { %1554 = shalt.err (!%p1551_p7)
}
  0x12   :  { %s1652_s7 = smov 256   ;;  %s1653_s8 = smov 16  }
  0x13   :  { %38 = dma.hbm_to_vmem [thread:$0]  %s1963_s1, 4096, %s33_s22, [#allocation6], %s1652_s7, %s1652_s7, %s1653_s8  }
  0x14   :  { %s1654_s11 = smov [#allocation2]   ;;  %s1555_s15 = scalar_lea.hbm %s1962_s0, 1024 }
  0x15   :  { %s20_s12 = sshll.u32 %s1654_s11, 4  ;;  %p1556_p8 = scmp.ne.s32.totalorder %s1962_s0, %s1555_s15  ;;  %s21_s12 = int_to_ptr.vmem [resolvable:$true] %s20_s12 }
  0x16   :  { %p1559_p9 = scmp.lt.u32.totalorder %s1555_s15, %s1962_s0 }
  0x18   :  { %p1561_p10 = pnand %p1559_p9, %p1556_p8 }
  0x1a   :  { %1564 = shalt.err (!%p1561_p10)
}
  0x1b   :  { %s1565_s20 = scalar_lea.vmem %s21_s12, 1024  ;;  %p1570_p12 = scmp.lt.s32.totalorder %s21_s12, %s21_s12 }
  0x1c   :  { %p1566_p11 = scmp.ne.s32.totalorder %s21_s12, %s1565_s20  ;;  %p1571_p13 = scmp.lt.s32.totalorder %s1565_s20, %s1565_s20 }
  0x1e   :  { %p1572_p0 = por %p1571_p13, %p1570_p12 }
  0x20   :  { %p1573_p1 = pnand %p1572_p0, %p1566_p11 }
  0x22   :  { %1576 = shalt.err (!%p1573_p1)
}
  0x23   :  { %s1655_s1 = smov 128   ;;  %s1656_s21 = smov 8  }
  0x24   :  { %26 = dma.hbm_to_vmem [thread:$0]  %s1962_s0, 1024, %s21_s12, [#allocation3], %s1655_s1, %s1655_s1, %s1656_s21  }
  0x25   :  { %s1657_s24 = smov [#allocation7]   ;;  %s1658_s26 = smov [#allocation8]  }
  0x26   :  { %s44_s25 = sshll.u32 %s1657_s24, 4  ;;  %s58_s27 = sshll.u32 %s1658_s26, 4  ;;  %s45_s25 = int_to_ptr.vmem [resolvable:$true] %s44_s25  ;;  %s1729_s27 = int_to_ptr.vmem [resolvable:$true] %s58_s27 }
  0x27   :  { %s1577_s30 = scalar_lea.hbm %s1964_s2, 2048 }
  0x28   :  { %p1578_p2 = scmp.ne.s32.totalorder %s1964_s2, %s1577_s30  ;;  %p1581_p3 = scmp.lt.u32.totalorder %s1577_s30, %s1964_s2 }
  0x2a   :  { %p1583_p4 = pnand %p1581_p3, %p1578_p2 }
  0x2c   :  { %1586 = shalt.err (!%p1583_p4)
}
  0x2d   :  { %s1587_s0 = scalar_lea.vmem %s45_s25, 2048  ;;  %p1592_p6 = scmp.lt.s32.totalorder %s45_s25, %s45_s25 }
  0x2e   :  { %p1588_p5 = scmp.ne.s32.totalorder %s45_s25, %s1587_s0  ;;  %p1593_p7 = scmp.lt.s32.totalorder %s1587_s0, %s1587_s0 }
  0x30   :  { %p1594_p8 = por %p1593_p7, %p1592_p6 }
  0x32   :  { %p1595_p9 = pnand %p1594_p8, %p1588_p5 }
  0x34   :  { %1598 = shalt.err (!%p1595_p9)
}
  0x35   :  { %50 = dma.hbm_to_vmem [thread:$0]  %s1964_s2, 2048, %s45_s25, [#allocation6], %s1652_s7, %s1652_s7, %s1653_s8  }
  0x36   :  { %s1599_s17 = scalar_lea.hbm %s1966_s4, 1024 }
  0x37   :  { %p1600_p10 = scmp.ne.s32.totalorder %s1966_s4, %s1599_s17  ;;  %p1603_p11 = scmp.lt.u32.totalorder %s1599_s17, %s1966_s4 }
  0x39   :  { %p1605_p12 = pnand %p1603_p11, %p1600_p10 }
  0x3b   :  { %1608 = shalt.err (!%p1605_p12)
}
  0x3c   :  { %s1609_s23 = scalar_lea.vmem %s1729_s27, 1024  ;;  %p1614_p0 = scmp.lt.s32.totalorder %s1729_s27, %s1729_s27 }
  0x3d   :  { %p1610_p13 = scmp.ne.s32.totalorder %s1729_s27, %s1609_s23  ;;  %p1615_p1 = scmp.lt.s32.totalorder %s1609_s23, %s1609_s23 }
  0x3f   :  { %p1616_p2 = por %p1615_p1, %p1614_p0 }
  0x41   :  { %p1617_p3 = pnand %p1616_p2, %p1610_p13 }
  0x43   :  { %1620 = shalt.err (!%p1617_p3)
}
  0x44   :  { %64 = dma.hbm_to_vmem [thread:$0]  %s1966_s4, 1024, %s1729_s27, [#allocation9], %s1655_s1, %s1655_s1, %s1656_s21  }
  0x45   :  { %1643 = dma.done.wait [#allocation3], 1024  }
  0x46   :  { %1644 = vsyncadd [#allocation3], 4294966272 }
  0x47   :  { %1645 = dma.done.wait [#allocation6], 6144  }
  0x48   :  { %1646 = vsyncadd [#allocation6], 4294961152 }
  0x49   :  { %1647 = dma.done.wait [#allocation9], 1024  }
  0x4a   :  { %1648 = vsyncadd [#allocation9], 4294966272  ;;  %v1659_v0 = vmov 0.0   ;;  %v104_v1 = vld [vmem:[#allocation5 + $0x8] sm:$0xff]  ;;  %v106_v2 = vld [vmem:[#allocation5 + $0x18] sm:$0xff]  ;;  %vm260_vm0 = vcmask 523264  }
  0x4b   :  { %211 = vmatprep.mubr.f32.mxu1 %v1659_v0  ;;  %528 = vmatprep.mubr.f32.mxu0 %v1659_v0  ;;  %v103_v3 = vld [vmem:[#allocation5] sm:$0xff]  ;;  %v1220_v4 = vpack.c.bf16 %v106_v2, %v104_v1  ;;  %v105_v5 = vld [vmem:[#allocation5 + $0x10] sm:$0xff]  ;;  %v108_v6 = vld [vmem:[#allocation5 + $0x28] sm:$0xff]  ;;  %vm1662_vm1 = vmmov 0   ;;  %s1663_s24 = smov [#allocation10]  }
  0x4c   :  { %v110_v7 = vld [vmem:[#allocation5 + $0x38] sm:$0xff]  ;;  %v1222_v8 = vpack.c.bf16 %v105_v5, %v103_v3  ;;  %v107_v10 = vld [vmem:[#allocation5 + $0x20] sm:$0xff]  ;;  %v109_v11 = vld [vmem:[#allocation5 + $0x30] sm:$0xff]  ;;  %s1156_s25 = sshll.u32 %s1663_s24, 4  ;;  %s1157_s25 = int_to_ptr.vmem [resolvable:$true] %s1156_s25 }
  0x4d   :  { %v1224_v9 = vpack.c.bf16 %v110_v7, %v108_v6  ;;  %v112_v12 = vld [vmem:[#allocation5 + $0x48] sm:$0xff]  ;;  %1221 = vmatprep.subr.bf16.mxu1 %v1220_v4  ;;  %v114_v13 = vld [vmem:[#allocation5 + $0x58] sm:$0xff]  ;;  %v1226_v14 = vpack.c.bf16 %v109_v11, %v107_v10  ;;  %v111_v16 = vld [vmem:[#allocation5 + $0x40] sm:$0xff]  ;;  %s1621_s26 = scalar_lea.vmem %s1157_s25, 128  ;;  %p1626_p5 = scmp.lt.s32.totalorder %s1157_s25, %s1157_s25 }
  0x4e   :  { %1223 = vmatpush1.bf16.msra.mxu1 %v1222_v8  ;;  %v1228_v15 = vpack.c.bf16 %v114_v13, %v112_v12  ;;  %v113_v17 = vld [vmem:[#allocation5 + $0x50] sm:$0xff]  ;;  %v116_v18 = vld [vmem:[#allocation5 + $0x68] sm:$0xff]  ;;  %v118_v19 = vld [vmem:[#allocation5 + $0x78] sm:$0xff]  ;;  %p1622_p4 = scmp.ne.s32.totalorder %s1157_s25, %s1621_s26  ;;  %p1627_p6 = scmp.lt.s32.totalorder %s1621_s26, %s1621_s26 }
  0x4f   :  { %1225 = vmatprep.subr.bf16.mxu1 %v1224_v9  ;;  %v1230_v20 = vpack.c.bf16 %v113_v17, %v111_v16  ;;  %v1232_v21 = vpack.c.bf16 %v118_v19, %v116_v18  ;;  %v115_v22 = vld [vmem:[#allocation5 + $0x60] sm:$0xff]  ;;  %v117_v23 = vld [vmem:[#allocation5 + $0x70] sm:$0xff]  ;;  %v120_v24 = vld [vmem:[#allocation5 + $0x88] sm:$0xff] }
  0x50   :  { %v122_v25 = vld [vmem:[#allocation5 + $0x98] sm:$0xff]  ;;  %v80_v26 = vld [vmem:[#allocation7 + $0x8] sm:$0xff]  ;;  %v79_v28 = vld [vmem:[#allocation7] sm:$0xff]  ;;  %v1234_v29 = vpack.c.bf16 %v117_v23, %v115_v22  ;;  %p1628_p7 = por %p1627_p6, %p1626_p5 }
  0x51   :  { %v82_v27 = vld [vmem:[#allocation7 + $0x18] sm:$0xff]  ;;  %v119_v30 = vld [vmem:[#allocation5 + $0x80] sm:$0xff]  ;;  %v121_v31 = vld [vmem:[#allocation5 + $0x90] sm:$0xff]  ;;  %v1236_v34 = vpack.c.bf16 %v122_v25, %v120_v24  ;;  %v137_v24 = vlaneseq }
  0x52   :  { %1227 = vmatpush1.bf16.msra.mxu1 %v1226_v14  ;;  %v1768_v32 = vpack.c.bf16 %v82_v27, %v80_v26  ;;  %v81_v33 = vld [vmem:[#allocation7 + $0x10] sm:$0xff]  ;;  %v124_v35 = vld [vmem:[#allocation5 + $0xa8] sm:$0xff]  ;;  %v86_v38 = vld [vmem:[#allocation7 + $0x38] sm:$0xff]  ;;  %v1238_v45 = vpack.c.bf16 %v121_v31, %v119_v30  ;;  %p1629_p8 = pnand %p1628_p7, %p1622_p4 }
  0x53   :  { %1229 = vmatprep.subr.bf16.mxu1 %v1228_v15  ;;  %v1770_v36 = vpack.c.bf16 %v81_v33, %v79_v28  ;;  %v84_v37 = vld [vmem:[#allocation7 + $0x28] sm:$0xff]  ;;  %v126_v39 = vld [vmem:[#allocation5 + $0xb8] sm:$0xff]  ;;  %v83_v41 = vld [vmem:[#allocation7 + $0x20] sm:$0xff]  ;;  %v138_v27 = vshrl.u32 %v137_v24, 7 }
  0x54   :  { %v1772_v40 = vpack.c.bf16 %v86_v38, %v84_v37  ;;  %v85_v42 = vld [vmem:[#allocation7 + $0x30] sm:$0xff]  ;;  %1285 = vmatprep.subr.bf16.mxu0 %v1768_v32  ;;  %v88_v43 = vld [vmem:[#allocation7 + $0x48] sm:$0xff]  ;;  %v90_v44 = vld [vmem:[#allocation7 + $0x58] sm:$0xff]  ;;  %v1240_v46 = vpack.c.bf16 %v126_v39, %v124_v35 }
  0x55   :  { %1287 = vmatpush1.bf16.msra.mxu0 %v1770_v36  ;;  %v123_v47 = vld [vmem:[#allocation5 + $0xa0] sm:$0xff]  ;;  %v125_v48 = vld [vmem:[#allocation5 + $0xb0] sm:$0xff]  ;;  %v128_v49 = vld [vmem:[#allocation5 + $0xc8] sm:$0xff]  ;;  %v1777_v50 = vpack.c.bf16 %v85_v42, %v83_v41  ;;  %v1779_v52 = vpack.c.bf16 %v90_v44, %v88_v43  ;;  %v139_v30 = vsub.s32 0, %v138_v27  ;;  %v143_v42 = vsub.s32 1, %v138_v27 }
  0x56   :  { %1231 = vmatpush1.bf16.msra.mxu1 %v1230_v20  ;;  %1289 = vmatprep.subr.bf16.mxu0 %v1772_v40  ;;  %v130_v51 = vld [vmem:[#allocation5 + $0xd8] sm:$0xff]  ;;  %v87_v53 = vld [vmem:[#allocation7 + $0x40] sm:$0xff]  ;;  %v89_v54 = vld [vmem:[#allocation7 + $0x50] sm:$0xff]  ;;  %v1242_v57 = vpack.c.bf16 %v125_v48, %v123_v47 }
  0x57   :  { %1233 = vmatprep.subr.bf16.mxu1 %v1232_v21  ;;  %v92_v55 = vld [vmem:[#allocation7 + $0x68] sm:$0xff]  ;;  %v94_v56 = vld [vmem:[#allocation7 + $0x78] sm:$0xff]  ;;  %v1244_v58 = vpack.c.bf16 %v130_v51, %v128_v49  ;;  %v127_v59 = vld [vmem:[#allocation5 + $0xc0] sm:$0xff]  ;;  %v1783_v62 = vpack.c.bf16 %v89_v54, %v87_v53 }
  0x58   :  { %v129_v60 = vld [vmem:[#allocation5 + $0xd0] sm:$0xff]  ;;  %v132_v61 = vld [vmem:[#allocation5 + $0xe8] sm:$0xff]  ;;  %v134_v63 = vld [vmem:[#allocation5 + $0xf8] sm:$0xff]  ;;  %v1785_v1 = vpack.c.bf16 %v94_v56, %v92_v55 }
  0x59   :  { %1291 = vmatpush1.bf16.msra.mxu0 %v1777_v50  ;;  %v91_v2 = vld [vmem:[#allocation7 + $0x60] sm:$0xff]  ;;  %v93_v3 = vld [vmem:[#allocation7 + $0x70] sm:$0xff]  ;;  %v1246_v4 = vpack.c.bf16 %v129_v60, %v127_v59  ;;  %v1248_v5 = vpack.c.bf16 %v134_v63, %v132_v61  ;;  %v96_v11 = vld [vmem:[#allocation2 + $0x8] sm:$0xff] }
  0x5a   :  { %1235 = vmatpush1.bf16.msra.mxu1 %v1234_v29  ;;  %1293 = vmatprep.subr.bf16.mxu0 %v1779_v52  ;;  %v131_v6 = vld [vmem:[#allocation5 + $0xe0] sm:$0xff]  ;;  %v133_v7 = vld [vmem:[#allocation5 + $0xf0] sm:$0xff]  ;;  %v1789_v8 = vpack.c.bf16 %v93_v3, %v91_v2  ;;  %v98_v13 = vld [vmem:[#allocation2 + $0x18] sm:$0xff] }
  0x5b   :  { %1237 = vmatprep.subr.bf16.mxu1 %v1236_v34  ;;  %v1250_v9 = vpack.c.bf16 %v133_v7, %v131_v6  ;;  %v95_v10 = vld [vmem:[#allocation2] sm:$0xff]  ;;  %v97_v12 = vld [vmem:[#allocation2 + $0x10] sm:$0xff]  ;;  %v100_v15 = vld [vmem:[#allocation2 + $0x28] sm:$0xff] }
  0x5c   :  { %v99_v14 = vld [vmem:[#allocation2 + $0x20] sm:$0xff]  ;;  %v101_v16 = vld [vmem:[#allocation2 + $0x30] sm:$0xff]  ;;  %v102_v17 = vld [vmem:[#allocation2 + $0x38] sm:$0xff] }
  0x5d   :  { %1295 = vmatpush1.bf16.msra.mxu0 %v1783_v62  ;;  %v135_v31 = vld [vmem:[%s1965_s3] sm:$0x3]  ;;  %s1660_s3 = smov 64  }
  0x5e   :  { %1239 = vmatpush1.bf16.msra.mxu1 %v1238_v45  ;;  %1297 = vmatprep.subr.bf16.mxu0 %v1785_v1  ;;  %v1846_v35 = vrot.slane %v135_v31, %v139_v30  ;;  %v1849_v43 = vrot.slane %v135_v31, %v143_v42 }
  0x5f   :  { %1241 = vmatprep.subr.bf16.mxu1 %v1240_v46 }
  0x61   :  { %1299 = vmatpush1.bf16.msra.mxu0 %v1789_v8 }
  0x62   :  { %1243 = vmatpush1.bf16.msra.mxu1 %v1242_v57  ;;  %1301 = vmatprep.subr.bf16.mxu0 %v1768_v32 }
  0x63   :  { %1245 = vmatprep.subr.bf16.mxu1 %v1244_v58 }
  0x66   :  { %1247 = vmatpush1.bf16.msra.mxu1 %v1246_v4 }
  0x67   :  { %1249 = vmatprep.subr.bf16.mxu1 %v1248_v5 }
  0x6a   :  { %1251 = vmatpush1.bf16.msra.mxu1 %v1250_v9 }
  0x6b   :  { %1253 = vmatprep.subr.bf16.mxu1 %v1768_v32 }
  0x6d   :  { %212 = vmatmul.mubr.f32.vlgmr.msra.gmra.mrb[0].mxu1 %v95_v10 }
  0x6e   :  { %1255 = vmatpush1.bf16.msra.mxu1 %v1770_v36  ;;  %217 = vmatprep.mubr.f32.mxu1 %v1659_v0 }
  0x6f   :  { %1257 = vmatprep.subr.bf16.mxu1 %v1772_v40 }
  0x71   :  { %218 = vmatmul.mubr.f32.gmra.mrb[2].mxu1 %v96_v11 }
  0x72   :  { %223 = vmatprep.mubr.f32.mxu1 %v1659_v0  ;;  %1259 = vmatpush1.bf16.msra.mxu1 %v1777_v50 }
  0x73   :  { %1261 = vmatprep.subr.bf16.mxu1 %v1779_v52 }
  0x75   :  { %224 = vmatmul.mubr.f32.gmra.mrb[4].mxu1 %v97_v12 }
  0x76   :  { %229 = vmatprep.mubr.f32.mxu1 %v1659_v0  ;;  %1263 = vmatpush1.bf16.msra.mxu1 %v1783_v62 }
  0x77   :  { %1265 = vmatprep.subr.bf16.mxu1 %v1785_v1 }
  0x79   :  { %230 = vmatmul.mubr.f32.gmra.mrb[6].mxu1 %v98_v13 }
  0x7a   :  { %235 = vmatprep.mubr.f32.mxu1 %v1659_v0  ;;  %1267 = vmatpush1.bf16.msra.mxu1 %v1789_v8 }
  0x7b   :  { %1269 = vmatprep.subr.bf16.mxu1 %v1768_v32 }
  0x7d   :  { %236 = vmatmul.mubr.f32.gmra.mrb[8].mxu1 %v99_v14 }
  0x7e   :  { %241 = vmatprep.mubr.f32.mxu1 %v1659_v0 }
  0x81   :  { %242 = vmatmul.mubr.f32.gmra.mrb[10].mxu1 %v100_v15 }
  0x82   :  { %247 = vmatprep.mubr.f32.mxu1 %v1659_v0 }
  0x85   :  { %248 = vmatmul.mubr.f32.gmra.mrb[12].mxu1 %v101_v16 }
  0x86   :  { %253 = vmatprep.mubr.f32.mxu1 %v1659_v0 }
  0x89   :  { %254 = vmatmul.mubr.f32.gmra.mrb[14].mxu1 %v102_v17 }
  0x8a   :  { %328 = vmatprep.mubr.f32.mxu1 %v1659_v0 }
  0x8d   :  { %329 = vmatmul.mubr.f32.vlgmr.msra.gmra.mrb[0].mxu1 %v1659_v0 }
  0x8e   :  { %1271 = vmatpush1.bf16.msra.mxu1 %v1770_v36  ;;  %428 = vmatprep.mubr.f32.mxu1 %v1659_v0 }
  0x8f   :  { %1273 = vmatprep.subr.bf16.mxu1 %v1772_v40 }
  0x92   :  { %1275 = vmatpush1.bf16.msra.mxu1 %v1777_v50 }
  0x93   :  { %1277 = vmatprep.subr.bf16.mxu1 %v1779_v52 }
  0x96   :  { %1279 = vmatpush1.bf16.msra.mxu1 %v1783_v62 }
  0x97   :  { %1281 = vmatprep.subr.bf16.mxu1 %v1785_v1 }
  0x9a   :  { %1283 = vmatpush1.bf16.msra.mxu1 %v1789_v8 }
 0x148   :  { %v1819_v18 = vpop.f32.mrb[4].mxu1 }
 0x149   :  { %v1821_v19 = vpop.f32.mrb[5].mxu1 }
 0x14c   :  { %v1823_v20 = vpop.f32.mrb[6].mxu1 }
 0x14d   :  { %v1825_v21 = vpop.f32.mrb[7].mxu1 }
 0x150   :  { %v1827_v22 = vpop.f32.mrb[8].mxu1 }
 0x151   :  { %v1829_v23 = vpop.f32.mrb[9].mxu1 }
 0x154   :  { %v1831_v25 = vpop.f32.mrb[10].mxu1 }
 0x155   :  { %v1833_v26 = vpop.f32.mrb[11].mxu1 }
 0x158   :  { %v1835_v28 = vpop.f32.mrb[12].mxu1 }
 0x159   :  { %v1837_v29 = vpop.f32.mrb[13].mxu1 }
 0x15c   :  { %v1842_v33 = vpop.f32.mrb[14].mxu1 }
 0x15d   :  { %v1844_v34 = vpop.f32.mrb[15].mxu1 }
 0x160   :  { %v330_v37 = vpop.f32.mrb[0].mxu1 }
 0x161   :  { %v1392_v38 = vadd.f32 %v330_v37, %v1846_v35  ;;  %v332_v39 = vpop.f32.mrb[1].mxu1  ;;  %v226_v37 = vadd.f32 %v1819_v18, %v1846_v35 }
 0x162   :  { %v1393_v44 = vadd.f32 %v332_v39, %v1849_v43 }
 0x163   :  { %v1167_v41 = vmul.f32 -1.442695, %v1392_v38  ;;  %v228_v38 = vadd.f32 %v1821_v19, %v1849_v43 }
 0x164   :  { %v1168_v51 = vmul.f32 -1.442695, %v1393_v44 }
 0x165   :  { %1437 = vpow2.f32 %v1167_v41 }
 0x166   :  { %1439 = vtanh.f32 %v1393_v44 }
 0x16f   :  { %v1438_v45 = vpop.eup %1437 }
 0x170   :  { %v343_v46 = vadd.f32 1.0, %v1438_v45  ;;  %v1440_v47 = vpop.eup %1439 }
 0x172   :  { %1441 = vrcp.f32 %v343_v46 }
 0x173   :  { %1443 = vpow2.f32 %v1168_v51 }
 0x17c   :  { %v1442_v48 = vpop.eup %1441 }
 0x17d   :  { %v351_v49 = vmul.f32 %v1442_v48, %v1440_v47  ;;  %v1444_v53 = vpop.eup %1443  ;;  %v350_v55 = vmul.f32 0.0, %v1442_v48 }
 0x17e   :  { %v344_v54 = vadd.f32 1.0, %v1444_v53 }
 0x17f   :  { %353 = vrot.lane.b32.xlu0 %v351_v49, %s1660_s3 }
 0x180   :  { %1445 = vrcp.f32 %v344_v54 }
 0x18a   :  { %v1446_v58 = vpop.eup %1445 }
 0x1f1   :  { %v354_v56 = vpop.permute.xlu0 %353 }
 0x1f2   :  { %v356_v57 = vadd.f32 %v354_v56, %v350_v55 }
 0x1f4   :  { %1447 = vtanh.f32 %v356_v57 }
 0x1fe   :  { %v1448_v59 = vpop.eup %1447 }
 0x1ff   :  { %v358_v60 = vmul.f32 %v1448_v59, %v1446_v58 }
 0x201   :  { %360 = vrot.lane.b32.xlu0 %v358_v60, %s1660_s3 }
 0x273   :  { %v361_v61 = vpop.permute.xlu0 %360 }
 0x274   :  { %1169 = vmatmul.mubr.msk.f32.vlgmr.msra.gmra.mrb[2].mxu1 %vm260_vm0, %v361_v61  ;;  %v232_v61 = vadd.f32 %v1823_v20, %v1846_v35 }
 0x275   :  { %1217 = vmatprep.mubr.msk.f32.mxu1 %vm1662_vm1, %v1659_v0 }
 0x347   :  { %v430_v63 = vpop.f32.mrb[2].mxu1 }
 0x348   :  { %v1394_v2 = vadd.f32 %v430_v63, %v1846_v35  ;;  %v432_v3 = vpop.f32.mrb[3].mxu1  ;;  %v234_v63 = vadd.f32 %v1825_v21, %v1849_v43 }
 0x349   :  { %v1395_v5 = vadd.f32 %v432_v3, %v1849_v43 }
 0x34a   :  { %v1170_v4 = vmul.f32 -1.442695, %v1394_v2 }
 0x34b   :  { %v1171_v12 = vmul.f32 -1.442695, %v1395_v5 }
 0x34c   :  { %1449 = vpow2.f32 %v1170_v4 }
 0x34d   :  { %1451 = vtanh.f32 %v1395_v5 }
 0x356   :  { %v1450_v6 = vpop.eup %1449 }
 0x357   :  { %v443_v7 = vadd.f32 1.0, %v1450_v6  ;;  %v1452_v9 = vpop.eup %1451 }
 0x359   :  { %1453 = vrcp.f32 %v443_v7 }
 0x35a   :  { %1455 = vpow2.f32 %v1171_v12 }
 0x363   :  { %v1454_v10 = vpop.eup %1453 }
 0x364   :  { %v451_v11 = vmul.f32 %v1454_v10, %v1452_v9  ;;  %v1456_v13 = vpop.eup %1455  ;;  %v450_v15 = vmul.f32 %v1454_v10, %v356_v57 }
 0x365   :  { %v444_v14 = vadd.f32 1.0, %v1456_v13 }
 0x366   :  { %453 = vrot.lane.b32.xlu1 %v451_v11, %s1660_s3 }
 0x367   :  { %1457 = vrcp.f32 %v444_v14 }
 0x371   :  { %v1458_v24 = vpop.eup %1457 }
 0x3d8   :  { %v454_v16 = vpop.permute.xlu1 %453 }
 0x3d9   :  { %v456_v17 = vadd.f32 %v454_v16, %v450_v15 }
 0x3db   :  { %1459 = vtanh.f32 %v456_v17 }
 0x3e5   :  { %v1460_v27 = vpop.eup %1459 }
 0x3e6   :  { %v458_v30 = vmul.f32 %v1460_v27, %v1458_v24 }
 0x3e8   :  { %460 = vrot.lane.b32.xlu1 %v458_v30, %s1660_s3 }
 0x45a   :  { %v461_v31 = vpop.permute.xlu1 %460 }
 0x45b   :  { %1172 = vmatmul.mubr.msk.f32.vlgmr.msra.gmra.mrb[0].mxu0 %vm260_vm0, %v461_v31  ;;  %v238_v31 = vadd.f32 %v1827_v22, %v1846_v35 }
 0x45c   :  { %1303 = vmatpush1.bf16.msra.mxu0 %v1770_v36  ;;  %628 = vmatprep.mubr.f32.mxu0 %v1659_v0 }
 0x45d   :  { %1305 = vmatprep.subr.bf16.mxu0 %v1772_v40 }
 0x460   :  { %1307 = vmatpush1.bf16.msra.mxu0 %v1777_v50 }
 0x461   :  { %1309 = vmatprep.subr.bf16.mxu0 %v1779_v52 }
 0x464   :  { %1311 = vmatpush1.bf16.msra.mxu0 %v1783_v62 }
 0x465   :  { %1313 = vmatprep.subr.bf16.mxu0 %v1785_v1 }
 0x468   :  { %1315 = vmatpush1.bf16.msra.mxu0 %v1789_v8 }
 0x469   :  { %1317 = vmatprep.subr.bf16.mxu0 %v1768_v32 }
 0x52e   :  { %v530_v39 = vpop.f32.mrb[0].mxu0 }
 0x52f   :  { %v535_v41 = vadd.f32 %v530_v39, %v226_v37  ;;  %v532_v42 = vpop.f32.mrb[1].mxu0  ;;  %v240_v37 = vadd.f32 %v1829_v23, %v1849_v43 }
 0x530   :  { %v536_v44 = vadd.f32 %v532_v42, %v228_v38 }
 0x531   :  { %v1173_v45 = vmul.f32 -1.442695, %v535_v41 }
 0x532   :  { %v1174_v53 = vmul.f32 -1.442695, %v536_v44 }
 0x533   :  { %1461 = vpow2.f32 %v1173_v45 }
 0x534   :  { %1463 = vtanh.f32 %v536_v44 }
 0x53d   :  { %v1462_v46 = vpop.eup %1461 }
 0x53e   :  { %v543_v47 = vadd.f32 1.0, %v1462_v46  ;;  %v1464_v48 = vpop.eup %1463 }
 0x540   :  { %1465 = vrcp.f32 %v543_v47 }
 0x541   :  { %1467 = vpow2.f32 %v1174_v53 }
 0x54a   :  { %v1466_v49 = vpop.eup %1465 }
 0x54b   :  { %v551_v51 = vmul.f32 %v1466_v49, %v1464_v48  ;;  %v1468_v18 = vpop.eup %1467  ;;  %v550_v19 = vmul.f32 %v1466_v49, %v456_v17 }
 0x54c   :  { %v544_v54 = vadd.f32 1.0, %v1468_v18 }
 0x54d   :  { %553 = vrot.lane.b32.xlu0 %v551_v51, %s1660_s3 }
 0x54e   :  { %1469 = vrcp.f32 %v544_v54 }
 0x558   :  { %v1470_v57 = vpop.eup %1469 }
 0x5bf   :  { %v554_v55 = vpop.permute.xlu0 %553 }
 0x5c0   :  { %v556_v56 = vadd.f32 %v554_v55, %v550_v19 }
 0x5c2   :  { %1471 = vtanh.f32 %v556_v56 }
 0x5cc   :  { %v1472_v58 = vpop.eup %1471 }
 0x5cd   :  { %v558_v59 = vmul.f32 %v1472_v58, %v1470_v57  ;;  %v244_v58 = vadd.f32 %v1831_v25, %v1846_v35 }
 0x5cf   :  { %560 = vrot.lane.b32.xlu1 %v558_v59, %s1660_s3  ;;  %v246_v59 = vadd.f32 %v1833_v26, %v1849_v43 }
 0x641   :  { %v561_v60 = vpop.permute.xlu1 %560 }
 0x642   :  { %1175 = vmatmul.mubr.msk.f32.vlgmr.msra.gmra.mrb[2].mxu0 %vm260_vm0, %v561_v60 }
 0x643   :  { %1319 = vmatpush1.bf16.msra.mxu0 %v1770_v36  ;;  %728 = vmatprep.mubr.f32.mxu0 %v1659_v0 }
 0x644   :  { %1321 = vmatprep.subr.bf16.mxu0 %v1772_v40 }
 0x647   :  { %1323 = vmatpush1.bf16.msra.mxu0 %v1777_v50 }
 0x648   :  { %1325 = vmatprep.subr.bf16.mxu0 %v1779_v52 }
 0x64b   :  { %1327 = vmatpush1.bf16.msra.mxu0 %v1783_v62 }
 0x64c   :  { %1329 = vmatprep.subr.bf16.mxu0 %v1785_v1 }
 0x64f   :  { %1331 = vmatpush1.bf16.msra.mxu0 %v1789_v8 }
 0x650   :  { %1333 = vmatprep.subr.bf16.mxu0 %v1768_v32 }
 0x715   :  { %v630_v2 = vpop.f32.mrb[2].mxu0 }
 0x716   :  { %v635_v3 = vadd.f32 %v630_v2, %v232_v61  ;;  %v632_v4 = vpop.f32.mrb[3].mxu0 }
 0x717   :  { %v636_v5 = vadd.f32 %v632_v4, %v234_v63 }
 0x718   :  { %v1176_v6 = vmul.f32 -1.442695, %v635_v3 }
 0x719   :  { %v1177_v13 = vmul.f32 -1.442695, %v636_v5 }
 0x71a   :  { %1473 = vpow2.f32 %v1176_v6 }
 0x71b   :  { %1475 = vtanh.f32 %v636_v5 }
 0x724   :  { %v1474_v7 = vpop.eup %1473 }
 0x725   :  { %v643_v9 = vadd.f32 1.0, %v1474_v7  ;;  %v1476_v10 = vpop.eup %1475 }
 0x727   :  { %1477 = vrcp.f32 %v643_v9 }
 0x728   :  { %1479 = vpow2.f32 %v1177_v13 }
 0x731   :  { %v1478_v11 = vpop.eup %1477 }
 0x732   :  { %v651_v12 = vmul.f32 %v1478_v11, %v1476_v10  ;;  %v1480_v20 = vpop.eup %1479  ;;  %v650_v21 = vmul.f32 %v1478_v11, %v556_v56 }
 0x733   :  { %v644_v14 = vadd.f32 1.0, %v1480_v20 }
 0x734   :  { %653 = vrot.lane.b32.xlu0 %v651_v12, %s1660_s3 }
 0x735   :  { %1481 = vrcp.f32 %v644_v14 }
 0x73f   :  { %v1482_v17 = vpop.eup %1481 }
 0x7a6   :  { %v654_v15 = vpop.permute.xlu0 %653 }
 0x7a7   :  { %v656_v16 = vadd.f32 %v654_v15, %v650_v21  ;;  %v250_v15 = vadd.f32 %v1835_v28, %v1846_v35 }
 0x7a9   :  { %1483 = vtanh.f32 %v656_v16 }
 0x7b3   :  { %v1484_v24 = vpop.eup %1483 }
 0x7b4   :  { %v658_v27 = vmul.f32 %v1484_v24, %v1482_v17 }
 0x7b6   :  { %660 = vrot.lane.b32.xlu1 %v658_v27, %s1660_s3 }
 0x828   :  { %v661_v30 = vpop.permute.xlu1 %660 }
 0x829   :  { %1178 = vmatmul.mubr.msk.f32.vlgmr.msra.gmra.mrb[4].mxu0 %vm260_vm0, %v661_v30 }
 0x82a   :  { %1335 = vmatpush1.bf16.msra.mxu0 %v1770_v36  ;;  %828 = vmatprep.mubr.f32.mxu0 %v1659_v0 }
 0x82b   :  { %1337 = vmatprep.subr.bf16.mxu0 %v1772_v40 }
 0x82e   :  { %1339 = vmatpush1.bf16.msra.mxu0 %v1777_v50 }
 0x82f   :  { %1341 = vmatprep.subr.bf16.mxu0 %v1779_v52 }
 0x832   :  { %1343 = vmatpush1.bf16.msra.mxu0 %v1783_v62 }
 0x833   :  { %1345 = vmatprep.subr.bf16.mxu0 %v1785_v1 }
 0x836   :  { %1347 = vmatpush1.bf16.msra.mxu0 %v1789_v8 }
 0x837   :  { %1349 = vmatprep.subr.bf16.mxu0 %v1768_v32 }
 0x8fc   :  { %v730_v38 = vpop.f32.mrb[4].mxu0 }
 0x8fd   :  { %v735_v39 = vadd.f32 %v730_v38, %v238_v31  ;;  %v732_v41 = vpop.f32.mrb[5].mxu0 }
 0x8fe   :  { %v736_v42 = vadd.f32 %v732_v41, %v240_v37 }
 0x8ff   :  { %v1179_v44 = vmul.f32 -1.442695, %v735_v39 }
 0x900   :  { %v1180_v51 = vmul.f32 -1.442695, %v736_v42 }
 0x901   :  { %1485 = vpow2.f32 %v1179_v44 }
 0x902   :  { %1487 = vtanh.f32 %v736_v42 }
 0x90b   :  { %v1486_v45 = vpop.eup %1485 }
 0x90c   :  { %v743_v46 = vadd.f32 1.0, %v1486_v45  ;;  %v1488_v47 = vpop.eup %1487  ;;  %v256_v45 = vadd.f32 %v1842_v33, %v1846_v35  ;;  %v1060_v33 = vld [vmem:[#allocation8 + $0x8] sm:$0xff]  ;;  %v1061_v35 = vld [vmem:[#allocation8 + $0x10] sm:$0xff] }
 0x90e   :  { %1489 = vrcp.f32 %v743_v46  ;;  %v258_v46 = vadd.f32 %v1844_v34, %v1849_v43 }
 0x90f   :  { %1491 = vpow2.f32 %v1180_v51 }
 0x918   :  { %v1490_v48 = vpop.eup %1489 }
 0x919   :  { %v751_v49 = vmul.f32 %v1490_v48, %v1488_v47  ;;  %v1492_v22 = vpop.eup %1491  ;;  %v750_v23 = vmul.f32 %v1490_v48, %v656_v16 }
 0x91a   :  { %v744_v53 = vadd.f32 1.0, %v1492_v22 }
 0x91b   :  { %753 = vrot.lane.b32.xlu0 %v751_v49, %s1660_s3 }
 0x91c   :  { %1493 = vrcp.f32 %v744_v53 }
 0x926   :  { %v1494_v19 = vpop.eup %1493 }
 0x98d   :  { %v754_v18 = vpop.permute.xlu0 %753 }
 0x98e   :  { %v756_v54 = vadd.f32 %v754_v18, %v750_v23 }
 0x990   :  { %1495 = vtanh.f32 %v756_v54 }
 0x99a   :  { %v1496_v55 = vpop.eup %1495 }
 0x99b   :  { %v758_v56 = vmul.f32 %v1496_v55, %v1494_v19  ;;  %v1059_v55 = vld [vmem:[#allocation8] sm:$0xff] }
 0x99c   :  { %v1381_v34 = vpack.c.bf16 %v1060_v33, %v1059_v55 }
 0x99d   :  { %760 = vrot.lane.b32.xlu1 %v758_v56, %s1660_s3  ;;  %v1661_v56 = vmov 0.0|0.0  }
 0x99e   :  { %1380 = vmatprep.subr.bf16.mxu1 %v1661_v56 }
 0x99f   :  { %1382 = vmatpush3.bf16.msra.mxu1 %v1381_v34 }
 0x9a0   :  { %1383 = vmatprep.subr.bf16.mxu1 %v1661_v56 }
 0xa0f   :  { %v761_v57 = vpop.permute.xlu1 %760 }
 0xa10   :  { %1181 = vmatmul.mubr.msk.f32.vlgmr.msra.gmra.mrb[6].mxu0 %vm260_vm0, %v761_v57 }
 0xa11   :  { %1351 = vmatpush1.bf16.msra.mxu0 %v1770_v36  ;;  %928 = vmatprep.mubr.f32.mxu0 %v1659_v0 }
 0xa12   :  { %1353 = vmatprep.subr.bf16.mxu0 %v1772_v40 }
 0xa15   :  { %1355 = vmatpush1.bf16.msra.mxu0 %v1777_v50 }
 0xa16   :  { %1357 = vmatprep.subr.bf16.mxu0 %v1779_v52 }
 0xa19   :  { %1359 = vmatpush1.bf16.msra.mxu0 %v1783_v62 }
 0xa1a   :  { %1361 = vmatprep.subr.bf16.mxu0 %v1785_v1 }
 0xa1d   :  { %1363 = vmatpush1.bf16.msra.mxu0 %v1789_v8 }
 0xa1e   :  { %1365 = vmatprep.subr.bf16.mxu0 %v1768_v32 }
 0xae3   :  { %v830_v60 = vpop.f32.mrb[6].mxu0 }
 0xae4   :  { %v835_v61 = vadd.f32 %v830_v60, %v244_v58  ;;  %v832_v63 = vpop.f32.mrb[7].mxu0  ;;  %v1063_v58 = vld [vmem:[#allocation8 + $0x20] sm:$0xff] }
 0xae5   :  { %v836_v2 = vadd.f32 %v832_v63, %v246_v59  ;;  %v1064_v59 = vld [vmem:[#allocation8 + $0x28] sm:$0xff]  ;;  %v1066_v63 = vld [vmem:[#allocation8 + $0x38] sm:$0xff] }
 0xae6   :  { %v1182_v3 = vmul.f32 -1.442695, %v835_v61  ;;  %v1387_v60 = vpack.c.bf16 %v1064_v59, %v1063_v58  ;;  %v1065_v61 = vld [vmem:[#allocation8 + $0x30] sm:$0xff] }
 0xae7   :  { %v1183_v32 = vmul.f32 -1.442695, %v836_v2 }
 0xae8   :  { %1497 = vpow2.f32 %v1182_v3 }
 0xae9   :  { %1499 = vtanh.f32 %v836_v2  ;;  %v1390_v2 = vpack.c.bf16 %v1066_v63, %v1065_v61 }
 0xaf2   :  { %v1498_v4 = vpop.eup %1497 }
 0xaf3   :  { %v843_v5 = vadd.f32 1.0, %v1498_v4  ;;  %v1500_v6 = vpop.eup %1499 }
 0xaf5   :  { %1501 = vrcp.f32 %v843_v5 }
 0xaf6   :  { %1503 = vpow2.f32 %v1183_v32 }
 0xaff   :  { %v1502_v7 = vpop.eup %1501 }
 0xb00   :  { %v851_v9 = vmul.f32 %v1502_v7, %v1500_v6  ;;  %v1504_v25 = vpop.eup %1503  ;;  %v850_v26 = vmul.f32 %v1502_v7, %v756_v54 }
 0xb01   :  { %v844_v10 = vadd.f32 1.0, %v1504_v25 }
 0xb02   :  { %853 = vrot.lane.b32.xlu0 %v851_v9, %s1660_s3 }
 0xb03   :  { %1505 = vrcp.f32 %v844_v10 }
 0xb0d   :  { %v1506_v13 = vpop.eup %1505 }
 0xb74   :  { %v854_v11 = vpop.permute.xlu0 %853 }
 0xb75   :  { %v856_v12 = vadd.f32 %v854_v11, %v850_v26  ;;  %v1190_v26 = vld [vmem:[%s1967_s5] ss:$0 sm:$0xff] }
 0xb77   :  { %1507 = vtanh.f32 %v856_v12 }
 0xb81   :  { %v1508_v20 = vpop.eup %1507 }
 0xb82   :  { %v858_v14 = vmul.f32 %v1508_v20, %v1506_v13 }
 0xb84   :  { %860 = vrot.lane.b32.xlu1 %v858_v14, %s1660_s3 }
 0xbf6   :  { %v861_v21 = vpop.permute.xlu1 %860 }
 0xbf7   :  { %1184 = vmatmul.mubr.msk.f32.vlgmr.msra.gmra.mrb[8].mxu0 %vm260_vm0, %v861_v21 }
 0xbf8   :  { %1367 = vmatpush1.bf16.msra.mxu0 %v1770_v36  ;;  %1028 = vmatprep.mubr.f32.mxu0 %v1659_v0  ;;  %v252_v36 = vadd.f32 %v1837_v29, %v1849_v43  ;;  %v1062_v43 = vld [vmem:[#allocation8 + $0x18] sm:$0xff] }
 0xbf9   :  { %1369 = vmatprep.subr.bf16.mxu0 %v1772_v40  ;;  %v1384_v57 = vpack.c.bf16 %v1062_v43, %v1061_v35 }
 0xbfb   :  { %1385 = vmatpush3.bf16.msra.mxu1 %v1384_v57 }
 0xbfc   :  { %1371 = vmatpush1.bf16.msra.mxu0 %v1777_v50  ;;  %1386 = vmatprep.subr.bf16.mxu1 %v1661_v56 }
 0xbfd   :  { %1373 = vmatprep.subr.bf16.mxu0 %v1779_v52 }
 0xbff   :  { %1388 = vmatpush3.bf16.msra.mxu1 %v1387_v60 }
 0xc00   :  { %1375 = vmatpush1.bf16.msra.mxu0 %v1783_v62  ;;  %1389 = vmatprep.subr.bf16.mxu1 %v1661_v56 }
 0xc01   :  { %1377 = vmatprep.subr.bf16.mxu0 %v1785_v1 }
 0xc03   :  { %1391 = vmatpush3.bf16.msra.mxu1 %v1390_v2 }
 0xc04   :  { %1379 = vmatpush1.bf16.msra.mxu0 %v1789_v8 }
 0xcca   :  { %v930_v16 = vpop.f32.mrb[8].mxu0 }
 0xccb   :  { %v935_v17 = vadd.f32 %v930_v16, %v250_v15  ;;  %v932_v24 = vpop.f32.mrb[9].mxu0 }
 0xccc   :  { %v936_v40 = vadd.f32 %v932_v24, %v252_v36 }
 0xccd   :  { %v1185_v27 = vmul.f32 -1.442695, %v935_v17 }
 0xcce   :  { %v1186_v8 = vmul.f32 -1.442695, %v936_v40 }
 0xccf   :  { %1509 = vpow2.f32 %v1185_v27 }
 0xcd0   :  { %1511 = vtanh.f32 %v936_v40 }
 0xcd9   :  { %v1510_v50 = vpop.eup %1509 }
 0xcda   :  { %v943_v52 = vadd.f32 1.0, %v1510_v50  ;;  %v1512_v62 = vpop.eup %1511 }
 0xcdc   :  { %1513 = vrcp.f32 %v943_v52 }
 0xcdd   :  { %1515 = vpow2.f32 %v1186_v8 }
 0xce6   :  { %v1514_v1 = vpop.eup %1513 }
 0xce7   :  { %v951_v30 = vmul.f32 %v1514_v1, %v1512_v62  ;;  %v1516_v28 = vpop.eup %1515  ;;  %v950_v29 = vmul.f32 %v1514_v1, %v856_v12 }
 0xce8   :  { %v944_v31 = vadd.f32 1.0, %v1516_v28 }
 0xce9   :  { %953 = vrot.lane.b32.xlu0 %v951_v30, %s1660_s3 }
 0xcea   :  { %1517 = vrcp.f32 %v944_v31 }
 0xcf4   :  { %v1518_v39 = vpop.eup %1517 }
 0xd5b   :  { %v954_v37 = vpop.permute.xlu0 %953 }
 0xd5c   :  { %v956_v38 = vadd.f32 %v954_v37, %v950_v29 }
 0xd5e   :  { %1519 = vtanh.f32 %v956_v38 }
 0xd68   :  { %v1520_v41 = vpop.eup %1519 }
 0xd69   :  { %v958_v42 = vmul.f32 %v1520_v41, %v1518_v39 }
 0xd6b   :  { %960 = vrot.lane.b32.xlu1 %v958_v42, %s1660_s3 }
 0xddd   :  { %v961_v44 = vpop.permute.xlu1 %960 }
 0xdde   :  { %1187 = vmatmul.mubr.msk.f32.vlgmr.msra.gmra.mrb[10].mxu0 %vm260_vm0, %v961_v44 }
 0xeb1   :  { %v1030_v47 = vpop.f32.mrb[10].mxu0 }
 0xeb2   :  { %v1035_v48 = vadd.f32 %v1030_v47, %v256_v45  ;;  %v1032_v49 = vpop.f32.mrb[11].mxu0 }
 0xeb3   :  { %v1036_v51 = vadd.f32 %v1032_v49, %v258_v46 }
 0xeb4   :  { %v1188_v22 = vmul.f32 -1.442695, %v1035_v48 }
 0xeb5   :  { %v1189_v3 = vmul.f32 -1.442695, %v1036_v51 }
 0xeb6   :  { %1521 = vpow2.f32 %v1188_v22 }
 0xeb7   :  { %1523 = vtanh.f32 %v1036_v51 }
 0xec0   :  { %v1522_v53 = vpop.eup %1521 }
 0xec1   :  { %v1043_v23 = vadd.f32 1.0, %v1522_v53  ;;  %v1524_v18 = vpop.eup %1523 }
 0xec3   :  { %1525 = vrcp.f32 %v1043_v23 }
 0xec4   :  { %1527 = vpow2.f32 %v1189_v3 }
 0xecd   :  { %v1526_v54 = vpop.eup %1525 }
 0xece   :  { %v1051_v19 = vmul.f32 %v1526_v54, %v1524_v18  ;;  %v1528_v4 = vpop.eup %1527  ;;  %v1050_v6 = vmul.f32 %v1526_v54, %v956_v38 }
 0xecf   :  { %v1044_v5 = vadd.f32 1.0, %v1528_v4 }
 0xed0   :  { %1053 = vrot.lane.b32.xlu0 %v1051_v19, %s1660_s3 }
 0xed1   :  { %1529 = vrcp.f32 %v1044_v5 }
 0xedb   :  { %v1530_v9 = vpop.eup %1529 }
 0xf42   :  { %v1054_v0 = vpop.permute.xlu0 %1053 }
 0xf43   :  { %v1056_v7 = vadd.f32 %v1054_v0, %v1050_v6 }
 0xf45   :  { %1531 = vtanh.f32 %v1056_v7 }
 0xf4f   :  { %v1532_v32 = vpop.eup %1531 }
 0xf50   :  { %v1058_v25 = vmul.f32 %v1532_v32, %v1530_v9 }
 0xf52   :  { %1075 = vrot.lane.b32.xlu1 %v1058_v25, %s1660_s3 }
 0xfc4   :  { %v1076_v10 = vpop.permute.xlu1 %1075 }
 0xfc5   :  { %1218 = vmatmul.mubr.msk.f32.vlgmr.msra.gmra.mrb[16].mxu1 %vm260_vm0, %v1076_v10 }
0x1098   :  { %v1145_v11 = vpop.f32.mrb[16].mxu1 }
0x1099   :  { %v1146_v12 = vadd.f32 %v1190_v26, %v1145_v11  ;;  %v1219_v13 = vpop.f32.mrb[17].mxu1 }
0x109b   :  { %1149 = vst [vmem:[#allocation10] sm:$0xff] %v1146_v12 }
0x109c   :  { %1632 = shalt.err (!%p1629_p8)
}
0x109d   :  { %s1633_s29 = scalar_lea.hbm %s1968_s6, 128 }
0x109e   :  { %p1634_p9 = scmp.ne.s32.totalorder %s1968_s6, %s1633_s29  ;;  %p1637_p10 = scmp.lt.u32.totalorder %s1633_s29, %s1968_s6 }
0x10a0   :  { %p1639_p11 = pnand %p1637_p10, %p1634_p9 }
0x10a2   :  { %1642 = shalt.err (!%p1639_p11)
}
0x10a3   :  { %1159 = dma.vmem_to_hbm [thread:$0]  %s1157_s25, 128, %s1968_s6, [#allocation4]  }
0x10a4   :  { %1649 = dma.done.wait [#allocation4], 128  }
0x10a5   :  { %1650 = vsyncadd [#allocation4], 4294967168 }
0x10a6   :  { %1163 = vsyncpa [#allocation3], 1 }
0x10a7   :  { %1164 = vsyncpa [#allocation6], 1 }
0x10a8   :  { %1165 = vsyncpa [#allocation9], 1 }
0x10a9   :  { %1166 = vsyncpa [#allocation4], 1 }

</bundles_post_ra>
